<compile_context>
chip_gen: v7x
topology: tpu7x:2x2x1
jax: 0.10.0
libtpu: 0.0.40
codegen_flags: <defaults>
</compile_context>

<pallas_src>
import functools

import jax
import jax.numpy as jnp
from jax.experimental import pallas as pl
from jax.experimental.pallas import tpu as pltpu


def toy_linear_kernel(x_ref, w1_ref, w2_ref, o_ref):
    # x_ref : (bt, m)   w1_ref : (m, k)   w2_ref : (k, n)   o_ref : (bt, n)
    h = jnp.dot(x_ref[...], w1_ref[...], preferred_element_type=jnp.float32)
    y = jnp.dot(h, w2_ref[...], preferred_element_type=jnp.float32)
    o_ref[...] = y.astype(o_ref.dtype)


@functools.partial(jax.jit, static_argnames=("block_b",))
def toy_linear_model(x, w1, w2, *, block_b=8192):
    """x: (B, m); w1: (k, m) torch layout; w2: (n, k) torch layout -> (B, n)."""
    B, m = x.shape
    k, m_w = w1.shape
    n, k_w = w2.shape
    assert m == m_w and k == k_w

    # One-time layout fix outside the kernel: (out, in) -> (in, out).
    w1_t = w1.T                       # (m, k)
    w2_t = w2.T                       # (k, n)

    itemsize = jnp.dtype(x.dtype).itemsize
    weight_bytes = (m * k + k * n) * itemsize

    # VMEM budget per grid step: double-buffered x & out tiles + f32 hidden
    # temp + resident weights.  40 MiB cap is safe on every generation
    # (v7x physical VMEM per TC is 64 MiB).
    per_row = 2 * (m + n) * itemsize + k * 4
    max_bt = max(8, ((40 << 20) - weight_bytes - (4 << 20)) // per_row)
    max_bt = max(8, (max_bt // 8) * 8)

    if B <= block_b and B <= 1024 and B <= max_bt:
        # Small batch: one full-array-dim tile (legal for any B, no padding).
        bt = B
    else:
        # Large batch: at least 2 tiles so both TensorCores get work on v7x,
        # rows-per-tile capped by block_b and the VMEM budget, sublane-aligned.
        target = min(block_b, -(-B // 2))          # ceil(B / 2)
        bt = min(target, max_bt)
        bt = max(8, (bt // 8) * 8)
    grid = (pl.cdiv(B, bt),)

    # Ragged last tile (if B % bt != 0) is handled by Pallas: OOB reads feed
    # only OOB rows, OOB writes are discarded.  No jnp.pad copies of x or out.

    vmem_need = 2 * bt * (m + n) * itemsize + bt * k * 4 + weight_bytes
    vmem_limit = int(min(max(vmem_need + (4 << 20), 32 << 20), 48 << 20))

    cost = pl.CostEstimate(
        flops=2 * B * (m * k + k * n),
        transcendentals=0,
        bytes_accessed=itemsize * (B * m + B * n) + weight_bytes,
    )

    out = pl.pallas_call(
        toy_linear_kernel,
        out_shape=jax.ShapeDtypeStruct((B, n), x.dtype),
        grid_spec=pl.GridSpec(
            grid=grid,
            in_specs=[
                pl.BlockSpec((bt, m), lambda i: (i, 0)),   # x batch tile
                pl.BlockSpec((m, k), lambda i: (0, 0)),    # w1 (VMEM-resident)
                pl.BlockSpec((k, n), lambda i: (0, 0)),    # w2 (VMEM-resident)
            ],
            out_specs=pl.BlockSpec((bt, n), lambda i: (i, 0)),
        ),
        compiler_params=pltpu.CompilerParams(
            dimension_semantics=("parallel",),
            vmem_limit_bytes=vmem_limit,
        ),
        cost_estimate=cost,
    )(x, w1_t, w2_t)

    return out


if __name__ == "__main__":
    # Module defaults: m=64 (input features), k=64 (hidden), n=32 (output).
    m, n, k = 64, 32, 64

    key = jax.random.PRNGKey(0)
    kx, kw1, kw2, kx2 = jax.random.split(key, 4)

    # Deterministic init mimicking nn.Linear's uniform(-1/sqrt(fan_in), ...),
    # stored PyTorch-style as (out_features, in_features).
    w1 = jax.random.uniform(
        kw1, (k, m), dtype=jnp.float32,
        minval=-1.0 / float(m) ** 0.5, maxval=1.0 / float(m) ** 0.5)
    w2 = jax.random.uniform(
        kw2, (n, k), dtype=jnp.float32,
        minval=-1.0 / float(k) ** 0.5, maxval=1.0 / float(k) ** 0.5)

    # --- small batch (single full-dim tile path), matches example_inputs() ---
    batch = 4
    x = jax.random.normal(kx, (batch, m), dtype=jnp.float32)
    out = jax.block_until_ready(toy_linear_model(x, w1, w2))
    ref = (x @ w1.T) @ w2.T
    assert out.shape == (batch, n)
    assert jnp.allclose(out, ref, atol=1e-5, rtol=1e-5)

    # --- multi-tile + ragged last tile path (forced with a small block_b) ---
    batch2 = 44
    x2 = jax.random.normal(kx2, (batch2, m), dtype=jnp.float32)
    out2 = jax.block_until_ready(toy_linear_model(x2, w1, w2, block_b=16))
    ref2 = (x2 @ w1.T) @ w2.T
    assert out2.shape == (batch2, n)
    assert jnp.allclose(out2, ref2, atol=1e-5, rtol=1e-5)

    print("KERNEL_OK")
</pallas_src>

<mosaic_0001>
module attributes {stable_mosaic.version = 11 : i64} {
  func.func @toy_linear_kernel(%arg0: i32, %arg1: memref<4x64xf32, #tpu.memory_space<vmem>>, %arg2: memref<64x64xf32, #tpu.memory_space<vmem>>, %arg3: memref<64x32xf32, #tpu.memory_space<vmem>>, %arg4: memref<4x32xf32, #tpu.memory_space<vmem>>) attributes {dimension_semantics = [#tpu.dimension_semantics<parallel>], iteration_bounds = array<i64: 1>, scalar_prefetch = 0 : i64, scratch_operands = 0 : i64, tpu.core_type = #tpu.core_type<tc>, window_params = [{transform_indices = @transform_0, window_bounds = array<i64: 4, 64>}, {pipeline_mode = #tpu.pipeline_mode<synchronous>, transform_indices = @transform_1, window_bounds = array<i64: 64, 64>}, {pipeline_mode = #tpu.pipeline_mode<synchronous>, transform_indices = @transform_2, window_bounds = array<i64: 64, 32>}, {transform_indices = @transform_3, window_bounds = array<i64: 4, 32>}]} {
    %c0 = arith.constant 0 : index
    %c0_0 = arith.constant 0 : index
    %0 = vector.load %arg1[%c0, %c0_0] : memref<4x64xf32, #tpu.memory_space<vmem>>, vector<4x64xf32>
    %c0_1 = arith.constant 0 : index
    %c0_2 = arith.constant 0 : index
    %1 = vector.load %arg2[%c0_1, %c0_2] : memref<64x64xf32, #tpu.memory_space<vmem>>, vector<64x64xf32>
    %cst = arith.constant dense<0.000000e+00> : vector<4x64xf32>
    %2 = tpu.matmul %0, %1, %cst {dimension_numbers = #tpu.dot_dimension_numbers<[1], [0], [0], [1], [0, 0, 1, 1], [], []>} : vector<4x64xf32>, vector<64x64xf32>, vector<4x64xf32> -> vector<4x64xf32>
    %c0_3 = arith.constant 0 : index
    %c0_4 = arith.constant 0 : index
    %3 = vector.load %arg3[%c0_3, %c0_4] : memref<64x32xf32, #tpu.memory_space<vmem>>, vector<64x32xf32>
    %cst_5 = arith.constant dense<0.000000e+00> : vector<4x32xf32>
    %4 = tpu.matmul %2, %3, %cst_5 {dimension_numbers = #tpu.dot_dimension_numbers<[1], [0], [0], [1], [0, 0, 1, 1], [], []>} : vector<4x64xf32>, vector<64x32xf32>, vector<4x32xf32> -> vector<4x32xf32>
    %c0_6 = arith.constant 0 : index
    %c0_7 = arith.constant 0 : index
    %5 = vector.load %arg4[%c0_6, %c0_7] : memref<4x32xf32, #tpu.memory_space<vmem>>, vector<4x32xf32>
    tpu.vector_store %arg4[%c0_6, %c0_7], %4 {strides = array<i32>} : memref<4x32xf32, #tpu.memory_space<vmem>>, vector<4x32xf32>,
    return
  }
  func.func @transform_0(%arg0: i32) -> (i32, i32) {
    %c0_i32 = arith.constant 0 : i32
    %c0_i32_0 = arith.constant 0 : i32
    return %arg0, %c0_i32 : i32, i32
  }
  func.func @transform_1(%arg0: i32) -> (i32, i32) {
    %c0_i32 = arith.constant 0 : i32
    %c0_i32_0 = arith.constant 0 : i32
    %c0_i32_1 = arith.constant 0 : i32
    return %c0_i32, %c0_i32_0 : i32, i32
  }
  func.func @transform_2(%arg0: i32) -> (i32, i32) {
    %c0_i32 = arith.constant 0 : i32
    %c0_i32_0 = arith.constant 0 : i32
    %c0_i32_1 = arith.constant 0 : i32
    return %c0_i32, %c0_i32_0 : i32, i32
  }
  func.func @transform_3(%arg0: i32) -> (i32, i32) {
    %c0_i32 = arith.constant 0 : i32
    %c0_i32_0 = arith.constant 0 : i32
    return %arg0, %c0_i32 : i32, i32
  }
}

</mosaic_0001>

<bundles_post_ra>
// kernel: toy_linear_model.1
= control target key start
LH: loop header
LB: loop body
LE: loop exit
PB: predicated region body
PF: predicated region fallthrough
CT: control target
= control target key end

     0   :  { %v305_v3 = vmov 0.0|0.0   ;;  %vm306_vm0 = vmmov 0   ;;  %v307_v6 = vmov 0.0   ;;  %s392_s0 = inlined_call_operand.vmem [shape: f32[4,64], index: 0, kind: input, shape index: {}]   ;;  %s393_s1 = inlined_call_operand.vmem [shape: f32[64,64], index: 1, kind: input, shape index: {}]   ;;  %s394_s2 = inlined_call_operand.vmem [shape: f32[64,32], index: 2, kind: input, shape index: {}]   ;;  %s395_s3 = inlined_call_operand.hbm [shape: f32[4,32], index: 3, kind: output, shape index: {}]  }
   0x1   :  { %v16_v0 = vld [vmem:[%s393_s1] sm:$0xff]  ;;  %v17_v1 = vld [vmem:[%s393_s1 + $0x8] sm:$0xff]  ;;  %v18_v2 = vld [vmem:[%s393_s1 + $0x10] sm:$0xff]  ;;  %253 = vmatprep.subr.bf16.mxu0 %v305_v3  ;;  %231 = vmatprep.mubr.msk.f32.mxu0 %vm306_vm0, %v307_v6 }
   0x2   :  { %v254_v4 = vpack.c.bf16 %v17_v1, %v16_v0  ;;  %v19_v5 = vld [vmem:[%s393_s1 + $0x18] sm:$0xff]  ;;  %265 = vmatprep.subr.bf16.mxu1 %v305_v3  ;;  %250 = vmatprep.mubr.msk.f32.mxu1 %vm306_vm0, %v307_v6  ;;  %v98_v8 = vld [vmem:[%s394_s2] sm:$0xff]  ;;  %v99_v9 = vld [vmem:[%s394_s2 + $0x8] sm:$0xff] }
   0x3   :  { %v257_v7 = vpack.c.bf16 %v19_v5, %v18_v2  ;;  %v100_v10 = vld [vmem:[%s394_s2 + $0x10] sm:$0xff]  ;;  %v20_v11 = vld [vmem:[%s393_s1 + $0x20] sm:$0xff]  ;;  %v21_v12 = vld [vmem:[%s393_s1 + $0x28] sm:$0xff]  ;;  %v266_v13 = vpack.c.bf16 %v99_v9, %v98_v8 }
   0x4   :  { %255 = vmatpush3.bf16.msra.mxu0 %v254_v4  ;;  %v101_v14 = vld [vmem:[%s394_s2 + $0x18] sm:$0xff] }
   0x5   :  { %256 = vmatprep.subr.bf16.mxu0 %v305_v3 }
   0x6   :  { %8 = vsyncpa [#allocation3], 0  ;;  %267 = vmatpush3.bf16.msra.mxu1 %v266_v13  ;;  %v269_v15 = vpack.c.bf16 %v101_v14, %v100_v10  ;;  %v260_v16 = vpack.c.bf16 %v21_v12, %v20_v11  ;;  %v102_v17 = vld [vmem:[%s394_s2 + $0x20] sm:$0xff]  ;;  %v103_v18 = vld [vmem:[%s394_s2 + $0x28] sm:$0xff]  ;;  %vm24_vm1 = vcmask 523264   ;;  %vm179_vm2 = vcmask 257024  }
   0x7   :  { %268 = vmatprep.subr.bf16.mxu1 %v305_v3  ;;  %v22_v19 = vld [vmem:[%s393_s1 + $0x30] sm:$0xff]  ;;  %v23_v20 = vld [vmem:[%s393_s1 + $0x38] sm:$0xff]  ;;  %v272_v21 = vpack.c.bf16 %v103_v18, %v102_v17  ;;  %v15_v26 = vld [vmem:[%s392_s0] sm:$0xf]  ;;  %s308_s1 = smov [#allocation2]  }
   0x8   :  { %258 = vmatpush3.bf16.msra.mxu0 %v257_v7  ;;  %v263_v22 = vpack.c.bf16 %v23_v20, %v22_v19  ;;  %v104_v23 = vld [vmem:[%s394_s2 + $0x30] sm:$0xff]  ;;  %v105_v24 = vld [vmem:[%s394_s2 + $0x38] sm:$0xff]  ;;  %s187_s19 = sshll.u32 %s308_s1, 4  ;;  %s188_s19 = int_to_ptr.vmem [resolvable:$true] %s187_s19 }
   0x9   :  { %259 = vmatprep.subr.bf16.mxu0 %v305_v3  ;;  %v275_v25 = vpack.c.bf16 %v105_v24, %v104_v23  ;;  %s281_s2 = scalar_lea.vmem %s188_s19, 64  ;;  %p286_p1 = scmp.lt.s32.totalorder %s188_s19, %s188_s19 }
   0xa   :  { %270 = vmatpush3.bf16.msra.mxu1 %v269_v15  ;;  %p282_p0 = scmp.ne.s32.totalorder %s188_s19, %s281_s2  ;;  %p287_p2 = scmp.lt.s32.totalorder %s281_s2, %s281_s2 }
   0xb   :  { %271 = vmatprep.subr.bf16.mxu1 %v305_v3 }
   0xc   :  { %261 = vmatpush3.bf16.msra.mxu0 %v260_v16  ;;  %p288_p3 = por %p287_p2, %p286_p1 }
   0xd   :  { %262 = vmatprep.subr.bf16.mxu0 %v305_v3 }
   0xe   :  { %273 = vmatpush3.bf16.msra.mxu1 %v272_v21  ;;  %p289_p4 = pnand %p288_p3, %p282_p0 }
   0xf   :  { %274 = vmatprep.subr.bf16.mxu1 %v305_v3 }
  0x10   :  { %264 = vmatpush3.bf16.msra.mxu0 %v263_v22 }
  0x12   :  { %276 = vmatpush3.bf16.msra.mxu1 %v275_v25 }
  0x13   :  { %232 = vmatmul.mubr.msk.f32.vlgmr.msra.gmra.mrb[0].mxu0 %vm24_vm1, %v15_v26 }
  0xe6   :  { %v94_v27 = vpop.f32.mrb[0].mxu0 }
  0xe7   :  { %v233_v28 = vpop.f32.mrb[1].mxu0  ;;  %251 = vmatmul.mubr.msk.f32.vlgmr.msra.gmra.mrb[0].mxu1 %vm24_vm1, %v94_v27 }
 0x1ba   :  { %v175_v29 = vpop.f32.mrb[0].mxu1 }
 0x1bb   :  { %180 = vst.msk [vmem:[#allocation2] sm:$0xf] %vm179_vm2, %v175_v29  ;;  %v252_v30 = vpop.f32.mrb[1].mxu1 }
 0x1bc   :  { %292 = shalt.err (!%p289_p4)
}
 0x1bd   :  { %s293_s21 = scalar_lea.hbm %s395_s3, 64 }
 0x1be   :  { %p294_p5 = scmp.ne.s32.totalorder %s395_s3, %s293_s21  ;;  %p297_p6 = scmp.lt.u32.totalorder %s293_s21, %s395_s3 }
 0x1c0   :  { %p299_p7 = pnand %p297_p6, %p294_p5 }
 0x1c2   :  { %302 = shalt.err (!%p299_p7)
}
 0x1c3   :  { %190 = dma.vmem_to_hbm [thread:$0]  %s188_s19, 64, %s395_s3, [#allocation3]  }
 0x1c4   :  { %303 = dma.done.wait [#allocation3], 64  }
 0x1c5   :  { %304 = vsyncadd [#allocation3], 4294967232 }
 0x1c6   :  { %194 = vsyncpa [#allocation3], 1 }

</bundles_post_ra>
